<compile_context>
chip_gen: v7x
topology: tpu7x:2x2x1
jax: 0.10.0
libtpu: 0.0.40
codegen_flags: <defaults>
</compile_context>

<pallas_src>
import jax
import jax.numpy as jnp
from jax.experimental import pallas as pl
from jax.experimental.pallas import tpu as pltpu

IN_DIM = 768
OUT_DIM = 768


def mlp_kernel(x_ref, w_ref, b_ref, o_ref):
    # x_ref: (tm, IN_DIM) bf16   -- row tile of activations
    # w_ref: (IN_DIM, OUT_DIM) bf16 -- VMEM-resident weight
    # b_ref: (1, OUT_DIM) f32
    # o_ref: (tm, OUT_DIM) f32
    acc = jnp.dot(x_ref[...], w_ref[...], preferred_element_type=jnp.float32)
    acc = acc + b_ref[...]               # broadcast (1, OUT_DIM) over rows, f32
    o_ref[...] = jnp.tanh(acc).astype(o_ref.dtype)


def mlp_layer(features, weight, bias, *, tm=256, matmul_dtype=jnp.bfloat16):
    """features: [M, 768], weight: [768, 768] laid out (in, out), bias: [768]."""
    M, K = features.shape
    assert K == IN_DIM
    assert weight.shape == (IN_DIM, OUT_DIM)
    assert bias.shape == (OUT_DIM,)
    out_dtype = features.dtype

    # Pick the row tile: whole (sublane-padded) batch for tiny M, else `tm`.
    m_pad8 = ((M + 7) // 8) * 8
    tm = min(tm, m_pad8)
    m_padded = pl.cdiv(M, tm) * tm

    x = features
    if m_padded != M:
        x = jnp.pad(x, ((0, m_padded - M), (0, 0)))

    # bf16 operands for the MXU; bias add + tanh run on the f32 accumulator.
    x = x.astype(matmul_dtype)
    w = weight.astype(matmul_dtype)
    bias2d = bias.reshape(1, OUT_DIM).astype(jnp.float32)

    grid = (m_padded // tm,)
    out = pl.pallas_call(
        mlp_kernel,
        out_shape=jax.ShapeDtypeStruct((m_padded, OUT_DIM), out_dtype),
        grid_spec=pltpu.PrefetchScalarGridSpec(
            num_scalar_prefetch=0,
            grid=grid,
            in_specs=[
                pl.BlockSpec((tm, IN_DIM), lambda i: (i, 0)),       # x row tile (streamed)
                pl.BlockSpec((IN_DIM, OUT_DIM), lambda i: (0, 0)),  # W resident, fetched once
                pl.BlockSpec((1, OUT_DIM), lambda i: (0, 0)),       # bias resident
            ],
            out_specs=pl.BlockSpec((tm, OUT_DIM), lambda i: (i, 0)),  # full-width writeback
        ),
        compiler_params=pltpu.CompilerParams(
            dimension_semantics=("parallel",),  # row tiles shard across TCs (v7x)
        ),
    )(x, w, bias2d)

    if m_padded != M:
        out = out[:M]
    return out


if __name__ == "__main__":
    key = jax.random.PRNGKey(0)
    k_x, k_w, k_b = jax.random.split(key, 3)

    # Small batch of CLS representations: [batch=8, hidden=768]
    batch = 8
    features = jax.random.normal(k_x, (batch, IN_DIM), dtype=jnp.float32)

    # PyTorch Linear layout is (out, in); kernel takes W = W_pt.T, i.e. (in, out).
    w_pt = jax.random.normal(k_w, (OUT_DIM, IN_DIM), dtype=jnp.float32) * 0.02
    bias = jax.random.normal(k_b, (OUT_DIM,), dtype=jnp.float32) * 0.02
    weight = w_pt.T

    out = mlp_layer(features, weight, bias)
    jax.block_until_ready(out)

    # Reference: same math as PyTorch (f32). Tolerance relaxed because the
    # kernel uses bf16 matmul operands with f32 accumulation.
    ref = jnp.tanh(features @ w_pt.T + bias)
    assert out.shape == (batch, OUT_DIM)
    assert jnp.allclose(out, ref, atol=3e-2, rtol=3e-2), float(jnp.max(jnp.abs(out - ref)))

    # Also check against a bf16-operand reference (tight tolerance).
    ref_bf16 = jnp.tanh(
        features.astype(jnp.bfloat16).astype(jnp.float32)
        @ w_pt.T.astype(jnp.bfloat16).astype(jnp.float32)
        + bias
    )
    assert jnp.allclose(out, ref_bf16, atol=2e-3, rtol=2e-3), float(
        jnp.max(jnp.abs(out - ref_bf16))
    )

    print("KERNEL_OK")
</pallas_src>

<mosaic_0001>
module attributes {stable_mosaic.version = 11 : i64} {
  func.func @mlp_kernel(%arg0: i32, %arg1: memref<8x768xbf16, #tpu.memory_space<vmem>>, %arg2: memref<768x768xbf16, #tpu.memory_space<vmem>>, %arg3: memref<1x768xf32, #tpu.memory_space<vmem>>, %arg4: memref<8x768xf32, #tpu.memory_space<vmem>>) attributes {dimension_semantics = [#tpu.dimension_semantics<parallel>], iteration_bounds = array<i64: 1>, scalar_prefetch = 0 : i64, scratch_operands = 0 : i64, tpu.core_type = #tpu.core_type<tc>, window_params = [{transform_indices = @transform_0, window_bounds = array<i64: 8, 768>}, {pipeline_mode = #tpu.pipeline_mode<synchronous>, transform_indices = @transform_1, window_bounds = array<i64: 768, 768>}, {pipeline_mode = #tpu.pipeline_mode<synchronous>, transform_indices = @transform_2, window_bounds = array<i64: 1, 768>}, {transform_indices = @transform_3, window_bounds = array<i64: 8, 768>}]} {
    %c0 = arith.constant 0 : index
    %c0_0 = arith.constant 0 : index
    %0 = vector.load %arg1[%c0, %c0_0] : memref<8x768xbf16, #tpu.memory_space<vmem>>, vector<8x768xbf16>
    %c0_1 = arith.constant 0 : index
    %c0_2 = arith.constant 0 : index
    %1 = vector.load %arg2[%c0_1, %c0_2] : memref<768x768xbf16, #tpu.memory_space<vmem>>, vector<768x768xbf16>
    %cst = arith.constant dense<0.000000e+00> : vector<8x768xf32>
    %2 = tpu.matmul %0, %1, %cst {dimension_numbers = #tpu.dot_dimension_numbers<[1], [0], [0], [1], [0, 0, 1, 1], [], []>} : vector<8x768xbf16>, vector<768x768xbf16>, vector<8x768xf32> -> vector<8x768xf32>
    %c0_3 = arith.constant 0 : index
    %c0_4 = arith.constant 0 : index
    %3 = vector.load %arg3[%c0_3, %c0_4] : memref<1x768xf32, #tpu.memory_space<vmem>>, vector<1x768xf32>
    %4 = vector.broadcast %3 : vector<1x768xf32> to vector<8x768xf32>
    %5 = arith.addf %2, %4 : vector<8x768xf32>
    %6 = math.tanh %5 : vector<8x768xf32>
    %c0_5 = arith.constant 0 : index
    %c0_6 = arith.constant 0 : index
    %7 = vector.load %arg4[%c0_5, %c0_6] : memref<8x768xf32, #tpu.memory_space<vmem>>, vector<8x768xf32>
    tpu.vector_store %arg4[%c0_5, %c0_6], %6 {strides = array<i32>} : memref<8x768xf32, #tpu.memory_space<vmem>>, vector<8x768xf32>,
    return
  }
  func.func @transform_0(%arg0: i32) -> (i32, i32) {
    %c0_i32 = arith.constant 0 : i32
    %c0_i32_0 = arith.constant 0 : i32
    return %arg0, %c0_i32 : i32, i32
  }
  func.func @transform_1(%arg0: i32) -> (i32, i32) {
    %c0_i32 = arith.constant 0 : i32
    %c0_i32_0 = arith.constant 0 : i32
    %c0_i32_1 = arith.constant 0 : i32
    return %c0_i32, %c0_i32_0 : i32, i32
  }
  func.func @transform_2(%arg0: i32) -> (i32, i32) {
    %c0_i32 = arith.constant 0 : i32
    %c0_i32_0 = arith.constant 0 : i32
    %c0_i32_1 = arith.constant 0 : i32
    return %c0_i32, %c0_i32_0 : i32, i32
  }
  func.func @transform_3(%arg0: i32) -> (i32, i32) {
    %c0_i32 = arith.constant 0 : i32
    %c0_i32_0 = arith.constant 0 : i32
    return %arg0, %c0_i32 : i32, i32
  }
}

</mosaic_0001>

<bundles_post_ra>
// kernel: tpu_custom_call.1
= control target key start
LH: loop header
LB: loop body
LE: loop exit
PB: predicated region body
PF: predicated region fallthrough
CT: control target
= control target key end

     0   :  { %8 = vsyncpa [#allocation3], 0  ;;  %s3215_s0 = inlined_call_operand.hbm [shape: bf16[8,768], index: 0, kind: input, shape index: {}]   ;;  %s3216_s1 = inlined_call_operand.hbm [shape: bf16[768,768], index: 1, kind: input, shape index: {}]   ;;  %s3217_s2 = inlined_call_operand.hbm [shape: f32[1,768], index: 2, kind: input, shape index: {}]   ;;  %s3218_s3 = inlined_call_operand.hbm [shape: f32[8,768], index: 3, kind: output, shape index: {}]  }
   0x1   :  { %9 = vsyncpa [#allocation6], 0 }
   0x2   :  { %10 = vsyncpa [#allocation4], 0  ;;  %s3105_s12 = smov [#allocation5]   ;;  %s3011_s16 = scalar_lea.hbm %s3216_s1, 36864 }
   0x3   :  { %s26_s13 = sshll.u32 %s3105_s12, 4  ;;  %p3012_p0 = scmp.ne.s32.totalorder %s3216_s1, %s3011_s16  ;;  %s27_s13 = int_to_ptr.vmem [resolvable:$true] %s26_s13 }
   0x4   :  { %p3015_p1 = scmp.lt.u32.totalorder %s3011_s16, %s3216_s1 }
   0x6   :  { %p3017_p2 = pnand %p3015_p1, %p3012_p0 }
   0x8   :  { %3020 = shalt.err (!%p3017_p2)
}
   0x9   :  { %s3021_s21 = scalar_lea.vmem %s27_s13, 36864  ;;  %p3026_p4 = scmp.lt.s32.totalorder %s27_s13, %s27_s13 }
   0xa   :  { %p3022_p3 = scmp.ne.s32.totalorder %s27_s13, %s3021_s21  ;;  %p3027_p5 = scmp.lt.s32.totalorder %s3021_s21, %s3021_s21 }
   0xc   :  { %p3028_p6 = por %p3027_p5, %p3026_p4 }
   0xe   :  { %p3029_p7 = pnand %p3028_p6, %p3022_p3 }
  0x10   :  { %3032 = shalt.err (!%p3029_p7)
}
  0x11   :  { %s3106_s22 = smov 384   ;;  %s3107_s23 = smov 24  }
  0x12   :  { %32 = dma.hbm_to_vmem [thread:$0]  %s3216_s1, 36864, %s27_s13, [#allocation6], %s3106_s22, %s3106_s22, %s3107_s23  }
  0x13   :  { %s3108_s26 = smov [#allocation2]   ;;  %s3109_s28 = smov [#allocation7]  }
  0x14   :  { %s17_s27 = sshll.u32 %s3108_s26, 4  ;;  %s39_s29 = sshll.u32 %s3109_s28, 4  ;;  %s18_s27 = int_to_ptr.vmem [resolvable:$true] %s17_s27  ;;  %s40_s29 = int_to_ptr.vmem [resolvable:$true] %s39_s29 }
  0x15   :  { %s3033_s5 = scalar_lea.hbm %s3215_s0, 384 }
  0x16   :  { %p3034_p8 = scmp.ne.s32.totalorder %s3215_s0, %s3033_s5  ;;  %p3037_p9 = scmp.lt.u32.totalorder %s3033_s5, %s3215_s0 }
  0x18   :  { %p3039_p10 = pnand %p3037_p9, %p3034_p8 }
  0x1a   :  { %3042 = shalt.err (!%p3039_p10)
}
  0x1b   :  { %s3043_s1 = scalar_lea.vmem %s18_s27, 384  ;;  %p3048_p12 = scmp.lt.s32.totalorder %s18_s27, %s18_s27 }
  0x1c   :  { %p3044_p11 = scmp.ne.s32.totalorder %s18_s27, %s3043_s1  ;;  %p3049_p13 = scmp.lt.s32.totalorder %s3043_s1, %s3043_s1 }
  0x1e   :  { %p3050_p0 = por %p3049_p13, %p3048_p12 }
  0x20   :  { %p3051_p1 = pnand %p3050_p0, %p3044_p11 }
  0x22   :  { %3054 = shalt.err (!%p3051_p1)
}
  0x23   :  { %20 = dma.hbm_to_vmem [thread:$0]  %s3215_s0, 384, %s18_s27, [#allocation3]  }
  0x24   :  { %s3055_s14 = scalar_lea.hbm %s3217_s2, 96 }
  0x25   :  { %p3056_p2 = scmp.ne.s32.totalorder %s3217_s2, %s3055_s14  ;;  %p3059_p3 = scmp.lt.u32.totalorder %s3055_s14, %s3217_s2 }
  0x27   :  { %p3061_p4 = pnand %p3059_p3, %p3056_p2 }
  0x29   :  { %3064 = shalt.err (!%p3061_p4)
}
  0x2a   :  { %s3065_s19 = scalar_lea.vmem %s40_s29, 96  ;;  %p3070_p6 = scmp.lt.s32.totalorder %s40_s29, %s40_s29 }
  0x2b   :  { %p3066_p5 = scmp.ne.s32.totalorder %s40_s29, %s3065_s19  ;;  %p3071_p7 = scmp.lt.s32.totalorder %s3065_s19, %s3065_s19 }
  0x2d   :  { %p3072_p8 = por %p3071_p7, %p3070_p6 }
  0x2f   :  { %p3073_p9 = pnand %p3072_p8, %p3066_p5 }
  0x31   :  { %3076 = shalt.err (!%p3073_p9)
}
  0x32   :  { %42 = dma.hbm_to_vmem [thread:$0]  %s3217_s2, 96, %s40_s29, [#allocation6]  }
  0x33   :  { %3099 = dma.done.wait [#allocation3], 384  }
  0x34   :  { %3100 = vsyncadd [#allocation3], 4294966912 }
  0x35   :  { %3101 = dma.done.wait [#allocation6], 36960  }
  0x36   :  { %3102 = vsyncadd [#allocation6], 4294930336  ;;  %v2561_v0 = vld [vmem:[#allocation5 + $0x4] ss:$24 sps:$4 sm:$0xff]   ;;  %v2565_v2 = vld [vmem:[#allocation5] ss:$24 sps:$4 sm:$0xff]  }
  0x37   :  { %v2563_v1 = vld [vmem:[#allocation5 + $0x304] ss:$24 sps:$4 sm:$0xff]   ;;  %1836 = vmatprep.subr.bf16.mxu1 %v2561_v0  ;;  %v2566_v3 = vld [vmem:[#allocation5 + $0x300] ss:$24 sps:$4 sm:$0xff]   ;;  %v2567_v4 = vld [vmem:[#allocation5 + $0x34] ss:$24 sps:$4 sm:$0xff]  }
  0x38   :  { %1877 = vmatprep.subr.bf16.mxu0 %v2563_v1  ;;  %1837 = vmatpush1.bf16.msra.mxu1 %v2565_v2  ;;  %v2569_v5 = vld [vmem:[#allocation5 + $0x334] ss:$24 sps:$4 sm:$0xff]   ;;  %v2571_v6 = vld [vmem:[#allocation5 + $0x30] ss:$24 sps:$4 sm:$0xff]   ;;  %v2573_v8 = vld [vmem:[#allocation5 + $0x64] ss:$24 sps:$4 sm:$0xff]  }
  0x39   :  { %1878 = vmatpush1.bf16.msra.mxu0 %v2566_v3  ;;  %1838 = vmatprep.subr.bf16.mxu1 %v2567_v4  ;;  %v2572_v7 = vld [vmem:[#allocation5 + $0x330] ss:$24 sps:$4 sm:$0xff]   ;;  %v2575_v9 = vld [vmem:[#allocation5 + $0x364] ss:$24 sps:$4 sm:$0xff]   ;;  %v2577_v10 = vld [vmem:[#allocation5 + $0x60] ss:$24 sps:$4 sm:$0xff]  }
  0x3a   :  { %1879 = vmatprep.subr.bf16.mxu0 %v2569_v5  ;;  %v2578_v11 = vld [vmem:[#allocation5 + $0x360] ss:$24 sps:$4 sm:$0xff]   ;;  %v2579_v12 = vld [vmem:[#allocation5 + $0x94] ss:$24 sps:$4 sm:$0xff]   ;;  %v2583_v14 = vld [vmem:[#allocation5 + $0x90] ss:$24 sps:$4 sm:$0xff]  }
  0x3b   :  { %v2581_v13 = vld [vmem:[#allocation5 + $0x394] ss:$24 sps:$4 sm:$0xff]   ;;  %v2584_v15 = vld [vmem:[#allocation5 + $0x390] ss:$24 sps:$4 sm:$0xff]   ;;  %v2585_v16 = vld [vmem:[#allocation5 + $0xc4] ss:$24 sps:$4 sm:$0xff]  }
  0x3c   :  { %1839 = vmatpush1.bf16.msra.mxu1 %v2571_v6  ;;  %v2587_v17 = vld [vmem:[#allocation5 + $0x3c4] ss:$24 sps:$4 sm:$0xff]   ;;  %v2589_v18 = vld [vmem:[#allocation5 + $0xc0] ss:$24 sps:$4 sm:$0xff]   ;;  %v2591_v20 = vld [vmem:[#allocation5 + $0xf4] ss:$24 sps:$4 sm:$0xff]  }
  0x3d   :  { %1880 = vmatpush1.bf16.msra.mxu0 %v2572_v7  ;;  %1840 = vmatprep.subr.bf16.mxu1 %v2573_v8  ;;  %v2590_v19 = vld [vmem:[#allocation5 + $0x3c0] ss:$24 sps:$4 sm:$0xff]   ;;  %v2593_v21 = vld [vmem:[#allocation5 + $0x3f4] ss:$24 sps:$4 sm:$0xff]   ;;  %v2595_v22 = vld [vmem:[#allocation5 + $0xf0] ss:$24 sps:$4 sm:$0xff]  }
  0x3e   :  { %1881 = vmatprep.subr.bf16.mxu0 %v2575_v9  ;;  %v2596_v23 = vld [vmem:[#allocation5 + $0x3f0] ss:$24 sps:$4 sm:$0xff]   ;;  %v2597_v24 = vld [vmem:[#allocation5 + $0x124] ss:$24 sps:$4 sm:$0xff]   ;;  %v2601_v26 = vld [vmem:[#allocation5 + $0x120] ss:$24 sps:$4 sm:$0xff]  }
  0x3f   :  { %v2599_v25 = vld [vmem:[#allocation5 + $0x424] ss:$24 sps:$4 sm:$0xff]   ;;  %v2602_v27 = vld [vmem:[#allocation5 + $0x420] ss:$24 sps:$4 sm:$0xff]   ;;  %v2603_v28 = vld [vmem:[#allocation5 + $0x154] ss:$24 sps:$4 sm:$0xff]  }
  0x40   :  { %1841 = vmatpush1.bf16.msra.mxu1 %v2577_v10  ;;  %v2605_v29 = vld [vmem:[#allocation5 + $0x454] ss:$24 sps:$4 sm:$0xff]   ;;  %v2607_v30 = vld [vmem:[#allocation5 + $0x150] ss:$24 sps:$4 sm:$0xff]   ;;  %v2609_v32 = vld [vmem:[#allocation5 + $0x184] ss:$24 sps:$4 sm:$0xff]  }
  0x41   :  { %1882 = vmatpush1.bf16.msra.mxu0 %v2578_v11  ;;  %1842 = vmatprep.subr.bf16.mxu1 %v2579_v12  ;;  %v2608_v31 = vld [vmem:[#allocation5 + $0x450] ss:$24 sps:$4 sm:$0xff]   ;;  %v2611_v33 = vld [vmem:[#allocation5 + $0x484] ss:$24 sps:$4 sm:$0xff]   ;;  %v2613_v34 = vld [vmem:[#allocation5 + $0x180] ss:$24 sps:$4 sm:$0xff]  }
  0x42   :  { %1883 = vmatprep.subr.bf16.mxu0 %v2581_v13  ;;  %v2614_v35 = vld [vmem:[#allocation5 + $0x480] ss:$24 sps:$4 sm:$0xff]   ;;  %v2615_v36 = vld [vmem:[#allocation5 + $0x1b4] ss:$24 sps:$4 sm:$0xff]   ;;  %v2619_v38 = vld [vmem:[#allocation5 + $0x1b0] ss:$24 sps:$4 sm:$0xff]  }
  0x43   :  { %v2617_v37 = vld [vmem:[#allocation5 + $0x4b4] ss:$24 sps:$4 sm:$0xff]   ;;  %v2620_v39 = vld [vmem:[#allocation5 + $0x4b0] ss:$24 sps:$4 sm:$0xff]   ;;  %v2621_v40 = vld [vmem:[#allocation5 + $0x1e4] ss:$24 sps:$4 sm:$0xff]  }
  0x44   :  { %1843 = vmatpush1.bf16.msra.mxu1 %v2583_v14  ;;  %v2623_v41 = vld [vmem:[#allocation5 + $0x4e4] ss:$24 sps:$4 sm:$0xff]   ;;  %v2625_v42 = vld [vmem:[#allocation5 + $0x1e0] ss:$24 sps:$4 sm:$0xff]   ;;  %v2627_v44 = vld [vmem:[#allocation5 + $0x214] ss:$24 sps:$4 sm:$0xff]  }
  0x45   :  { %1884 = vmatpush1.bf16.msra.mxu0 %v2584_v15  ;;  %1844 = vmatprep.subr.bf16.mxu1 %v2585_v16  ;;  %v2626_v43 = vld [vmem:[#allocation5 + $0x4e0] ss:$24 sps:$4 sm:$0xff]   ;;  %v2629_v45 = vld [vmem:[#allocation5 + $0x514] ss:$24 sps:$4 sm:$0xff]   ;;  %v2631_v49 = vld [vmem:[#allocation5 + $0x210] ss:$24 sps:$4 sm:$0xff]  }
  0x46   :  { %1885 = vmatprep.subr.bf16.mxu0 %v2587_v17  ;;  %v52_v46 = vld [vmem:[#allocation2] sm:$0xff]  ;;  %v53_v48 = vld [vmem:[#allocation2 + $0x8] sm:$0xff]  ;;  %v2633_v52 = vld [vmem:[#allocation5 + $0x244] ss:$24 sps:$4 sm:$0xff]   ;;  %s3110_s2 = smov [#allocation8]  }
  0x47   :  { %v3167_v47 = vcombine.high %v52_v46, %v52_v46  ;;  %v2632_v50 = vld [vmem:[#allocation5 + $0x510] ss:$24 sps:$4 sm:$0xff]   ;;  %v3169_v51 = vcombine.high %v53_v48, %v53_v48  ;;  %v2635_v53 = vld [vmem:[#allocation5 + $0x544] ss:$24 sps:$4 sm:$0xff]   ;;  %v2637_v54 = vld [vmem:[#allocation5 + $0x240] ss:$24 sps:$4 sm:$0xff]   ;;  %v3173_v6 = vcombine.low %v52_v46, %v52_v46  ;;  %v3175_v7 = vcombine.low %v53_v48, %v53_v48 }
  0x48   :  { %1845 = vmatpush1.bf16.msra.mxu1 %v2589_v18  ;;  %v2638_v55 = vld [vmem:[#allocation5 + $0x540] ss:$24 sps:$4 sm:$0xff]   ;;  %v2639_v56 = vld [vmem:[#allocation5 + $0x274] ss:$24 sps:$4 sm:$0xff]   ;;  %v2643_v58 = vld [vmem:[#allocation5 + $0x270] ss:$24 sps:$4 sm:$0xff]  }
  0x49   :  { %1886 = vmatpush1.bf16.msra.mxu0 %v2590_v19  ;;  %1846 = vmatprep.subr.bf16.mxu1 %v2591_v20  ;;  %v2641_v57 = vld [vmem:[#allocation5 + $0x574] ss:$24 sps:$4 sm:$0xff]   ;;  %v2644_v59 = vld [vmem:[#allocation5 + $0x570] ss:$24 sps:$4 sm:$0xff]   ;;  %v2645_v60 = vld [vmem:[#allocation5 + $0x2a4] ss:$24 sps:$4 sm:$0xff]  }
  0x4a   :  { %1887 = vmatprep.subr.bf16.mxu0 %v2593_v21  ;;  %1868 = vmatprep.mubr.bf16.mxu1 %v3167_v47  ;;  %v2647_v61 = vld [vmem:[#allocation5 + $0x5a4] ss:$24 sps:$4 sm:$0xff]   ;;  %v2649_v62 = vld [vmem:[#allocation5 + $0x2a0] ss:$24 sps:$4 sm:$0xff]   ;;  %v2651_v0 = vld [vmem:[#allocation5 + $0x2d4] ss:$24 sps:$4 sm:$0xff]  }
  0x4b   :  { %1909 = vmatprep.mubr.bf16.mxu0 %v3169_v51  ;;  %v2650_v63 = vld [vmem:[#allocation5 + $0x5a0] ss:$24 sps:$4 sm:$0xff]   ;;  %v2653_v1 = vld [vmem:[#allocation5 + $0x5d4] ss:$24 sps:$4 sm:$0xff]   ;;  %v2655_v2 = vld [vmem:[#allocation5 + $0x2d0] ss:$24 sps:$4 sm:$0xff]  }
  0x4c   :  { %1847 = vmatpush1.bf16.msra.mxu1 %v2595_v22  ;;  %v2656_v3 = vld [vmem:[#allocation5 + $0x5d0] ss:$24 sps:$4 sm:$0xff]   ;;  %v2661_v4 = vld [vmem:[#allocation5 + $0x604] ss:$24 sps:$4 sm:$0xff]   ;;  %v2659_v8 = vld [vmem:[#allocation5 + $0x600] ss:$24 sps:$4 sm:$0xff]  }
  0x4d   :  { %1888 = vmatpush1.bf16.msra.mxu0 %v2596_v23  ;;  %1848 = vmatprep.subr.bf16.mxu1 %v2597_v24  ;;  %v2664_v5 = vld [vmem:[#allocation5 + $0xc] ss:$24 sps:$4 sm:$0xff]   ;;  %v2662_v9 = vld [vmem:[#allocation5 + $0x8] ss:$24 sps:$4 sm:$0xff]   ;;  %v2672_v11 = vld [vmem:[#allocation5 + $0x3c] ss:$24 sps:$4 sm:$0xff]  }
  0x4e   :  { %1889 = vmatprep.subr.bf16.mxu0 %v2599_v25  ;;  %v2669_v10 = vld [vmem:[#allocation5 + $0x634] ss:$24 sps:$4 sm:$0xff]   ;;  %v2667_v12 = vld [vmem:[#allocation5 + $0x630] ss:$24 sps:$4 sm:$0xff]   ;;  %v2675_v14 = vld [vmem:[#allocation5 + $0x664] ss:$24 sps:$4 sm:$0xff]  }
  0x4f   :  { %v2670_v13 = vld [vmem:[#allocation5 + $0x38] ss:$24 sps:$4 sm:$0xff]   ;;  %v2678_v15 = vld [vmem:[#allocation5 + $0x6c] ss:$24 sps:$4 sm:$0xff]   ;;  %v2676_v17 = vld [vmem:[#allocation5 + $0x68] ss:$24 sps:$4 sm:$0xff]  }
  0x50   :  { %1849 = vmatpush1.bf16.msra.mxu1 %v2601_v26  ;;  %v2673_v16 = vld [vmem:[#allocation5 + $0x660] ss:$24 sps:$4 sm:$0xff]   ;;  %v2681_v18 = vld [vmem:[#allocation5 + $0x694] ss:$24 sps:$4 sm:$0xff]   ;;  %v2679_v20 = vld [vmem:[#allocation5 + $0x690] ss:$24 sps:$4 sm:$0xff]  }
  0x51   :  { %1890 = vmatpush1.bf16.msra.mxu0 %v2602_v27  ;;  %1850 = vmatprep.subr.bf16.mxu1 %v2603_v28  ;;  %v2684_v19 = vld [vmem:[#allocation5 + $0x9c] ss:$24 sps:$4 sm:$0xff]   ;;  %v2682_v21 = vld [vmem:[#allocation5 + $0x98] ss:$24 sps:$4 sm:$0xff]   ;;  %v2690_v23 = vld [vmem:[#allocation5 + $0xcc] ss:$24 sps:$4 sm:$0xff]  }
  0x52   :  { %1891 = vmatprep.subr.bf16.mxu0 %v2605_v29  ;;  %v2687_v22 = vld [vmem:[#allocation5 + $0x6c4] ss:$24 sps:$4 sm:$0xff]   ;;  %v2685_v24 = vld [vmem:[#allocation5 + $0x6c0] ss:$24 sps:$4 sm:$0xff]   ;;  %v2693_v26 = vld [vmem:[#allocation5 + $0x6f4] ss:$24 sps:$4 sm:$0xff]  }
  0x53   :  { %v2688_v25 = vld [vmem:[#allocation5 + $0xc8] ss:$24 sps:$4 sm:$0xff]   ;;  %v2696_v27 = vld [vmem:[#allocation5 + $0xfc] ss:$24 sps:$4 sm:$0xff]   ;;  %v2694_v29 = vld [vmem:[#allocation5 + $0xf8] ss:$24 sps:$4 sm:$0xff]  }
  0x54   :  { %1851 = vmatpush1.bf16.msra.mxu1 %v2607_v30  ;;  %v2691_v28 = vld [vmem:[#allocation5 + $0x6f0] ss:$24 sps:$4 sm:$0xff]   ;;  %v2699_v30 = vld [vmem:[#allocation5 + $0x724] ss:$24 sps:$4 sm:$0xff]   ;;  %s2223_s21 = sshll.u32 %s3110_s2, 4  ;;  %s2224_s21 = int_to_ptr.vmem [resolvable:$true] %s2223_s21 }
  0x55   :  { %1892 = vmatpush1.bf16.msra.mxu0 %v2608_v31  ;;  %1852 = vmatprep.subr.bf16.mxu1 %v2609_v32  ;;  %v2702_v31 = vld [vmem:[#allocation5 + $0x12c] ss:$24 sps:$4 sm:$0xff]   ;;  %v3180_v32 = vld [vmem:[#allocation2 + $0x10] sm:$0xff]  ;;  %v2715_v46 = vld [vmem:[#allocation5 + $0x7b0] ss:$24 sps:$4 sm:$0xff]   ;;  %s3077_s22 = scalar_lea.vmem %s2224_s21, 768  ;;  %p3082_p11 = scmp.lt.s32.totalorder %s2224_s21, %s2224_s21 }
  0x56   :  { %1893 = vmatprep.subr.bf16.mxu0 %v2611_v33  ;;  %v2697_v33 = vld [vmem:[#allocation5 + $0x720] ss:$24 sps:$4 sm:$0xff]   ;;  %p3078_p10 = scmp.ne.s32.totalorder %s2224_s21, %s3077_s22  ;;  %p3083_p12 = scmp.lt.s32.totalorder %s3077_s22, %s3077_s22 }
  0x57   :  { %v2718_v48 = vld [vmem:[#allocation5 + $0x1b8] ss:$24 sps:$4 sm:$0xff]  }
  0x58   :  { %1853 = vmatpush1.bf16.msra.mxu1 %v2613_v34  ;;  %v3184_v34 = vcombine.high %v3180_v32, %v3180_v32  ;;  %p3084_p13 = por %p3083_p12, %p3082_p11 }
  0x59   :  { %1894 = vmatpush1.bf16.msra.mxu0 %v2614_v35  ;;  %1854 = vmatprep.subr.bf16.mxu1 %v2615_v36  ;;  %v2700_v35 = vld [vmem:[#allocation5 + $0x128] ss:$24 sps:$4 sm:$0xff]   ;;  %v2705_v36 = vld [vmem:[#allocation5 + $0x754] ss:$24 sps:$4 sm:$0xff]  }
  0x5a   :  { %1895 = vmatprep.subr.bf16.mxu0 %v2617_v37  ;;  %v2708_v37 = vld [vmem:[#allocation5 + $0x15c] ss:$24 sps:$4 sm:$0xff]   ;;  %p3085_p0 = pnand %p3084_p13, %p3078_p10 }
  0x5c   :  { %1855 = vmatpush1.bf16.msra.mxu1 %v2619_v38  ;;  %v2703_v38 = vld [vmem:[#allocation5 + $0x750] ss:$24 sps:$4 sm:$0xff]  }
  0x5d   :  { %1896 = vmatpush1.bf16.msra.mxu0 %v2620_v39  ;;  %1856 = vmatprep.subr.bf16.mxu1 %v2621_v40  ;;  %v2706_v39 = vld [vmem:[#allocation5 + $0x158] ss:$24 sps:$4 sm:$0xff]   ;;  %v2711_v40 = vld [vmem:[#allocation5 + $0x784] ss:$24 sps:$4 sm:$0xff]  }
  0x5e   :  { %1897 = vmatprep.subr.bf16.mxu0 %v2623_v41  ;;  %v2714_v41 = vld [vmem:[#allocation5 + $0x18c] ss:$24 sps:$4 sm:$0xff]  }
  0x60   :  { %1857 = vmatpush1.bf16.msra.mxu1 %v2625_v42  ;;  %v2709_v42 = vld [vmem:[#allocation5 + $0x780] ss:$24 sps:$4 sm:$0xff]  }
  0x61   :  { %1898 = vmatpush1.bf16.msra.mxu0 %v2626_v43  ;;  %1858 = vmatprep.subr.bf16.mxu1 %v2627_v44  ;;  %v2712_v43 = vld [vmem:[#allocation5 + $0x188] ss:$24 sps:$4 sm:$0xff]   ;;  %v2717_v44 = vld [vmem:[#allocation5 + $0x7b4] ss:$24 sps:$4 sm:$0xff]  }
  0x62   :  { %1899 = vmatprep.subr.bf16.mxu0 %v2629_v45  ;;  %v2720_v45 = vld [vmem:[#allocation5 + $0x1bc] ss:$24 sps:$4 sm:$0xff]  }
  0x64   :  { %1859 = vmatpush1.bf16.msra.mxu1 %v2631_v49  ;;  %v2723_v49 = vld [vmem:[#allocation5 + $0x7e4] ss:$24 sps:$4 sm:$0xff]  }
  0x65   :  { %1900 = vmatpush1.bf16.msra.mxu0 %v2632_v50  ;;  %1860 = vmatprep.subr.bf16.mxu1 %v2633_v52  ;;  %v2726_v50 = vld [vmem:[#allocation5 + $0x1ec] ss:$24 sps:$4 sm:$0xff]   ;;  %v2721_v52 = vld [vmem:[#allocation5 + $0x7e0] ss:$24 sps:$4 sm:$0xff]  }
  0x66   :  { %1901 = vmatprep.subr.bf16.mxu0 %v2635_v53  ;;  %v2724_v53 = vld [vmem:[#allocation5 + $0x1e8] ss:$24 sps:$4 sm:$0xff]  }
  0x68   :  { %1861 = vmatpush1.bf16.msra.mxu1 %v2637_v54  ;;  %v2729_v54 = vld [vmem:[#allocation5 + $0x814] ss:$24 sps:$4 sm:$0xff]  }
  0x69   :  { %1902 = vmatpush1.bf16.msra.mxu0 %v2638_v55  ;;  %1862 = vmatprep.subr.bf16.mxu1 %v2639_v56  ;;  %v2732_v55 = vld [vmem:[#allocation5 + $0x21c] ss:$24 sps:$4 sm:$0xff]   ;;  %v2727_v56 = vld [vmem:[#allocation5 + $0x810] ss:$24 sps:$4 sm:$0xff]  }
  0x6a   :  { %1903 = vmatprep.subr.bf16.mxu0 %v2641_v57  ;;  %v2730_v57 = vld [vmem:[#allocation5 + $0x218] ss:$24 sps:$4 sm:$0xff]  }
  0x6c   :  { %1863 = vmatpush1.bf16.msra.mxu1 %v2643_v58  ;;  %v2735_v58 = vld [vmem:[#allocation5 + $0x844] ss:$24 sps:$4 sm:$0xff]  }
  0x6d   :  { %1904 = vmatpush1.bf16.msra.mxu0 %v2644_v59  ;;  %1864 = vmatprep.subr.bf16.mxu1 %v2645_v60  ;;  %v2738_v59 = vld [vmem:[#allocation5 + $0x24c] ss:$24 sps:$4 sm:$0xff]   ;;  %v2733_v60 = vld [vmem:[#allocation5 + $0x840] ss:$24 sps:$4 sm:$0xff]  }
  0x6e   :  { %1905 = vmatprep.subr.bf16.mxu0 %v2647_v61  ;;  %v2736_v61 = vld [vmem:[#allocation5 + $0x248] ss:$24 sps:$4 sm:$0xff]  }
  0x70   :  { %1865 = vmatpush1.bf16.msra.mxu1 %v2649_v62  ;;  %v2741_v62 = vld [vmem:[#allocation5 + $0x874] ss:$24 sps:$4 sm:$0xff]  }
  0x71   :  { %1906 = vmatpush1.bf16.msra.mxu0 %v2650_v63  ;;  %1866 = vmatprep.subr.bf16.mxu1 %v2651_v0  ;;  %v2744_v63 = vld [vmem:[#allocation5 + $0x27c] ss:$24 sps:$4 sm:$0xff]   ;;  %v2739_v0 = vld [vmem:[#allocation5 + $0x870] ss:$24 sps:$4 sm:$0xff]  }
  0x72   :  { %1907 = vmatprep.subr.bf16.mxu0 %v2653_v1  ;;  %v2742_v1 = vld [vmem:[#allocation5 + $0x278] ss:$24 sps:$4 sm:$0xff]  }
  0x74   :  { %1867 = vmatpush1.bf16.msra.mxu1 %v2655_v2  ;;  %v2747_v2 = vld [vmem:[#allocation5 + $0x8a4] ss:$24 sps:$4 sm:$0xff]  }
  0x75   :  { %1908 = vmatpush1.bf16.msra.mxu0 %v2656_v3  ;;  %1959 = vmatprep.subr.bf16.mxu1 %v2664_v5  ;;  %v2750_v3 = vld [vmem:[#allocation5 + $0x2ac] ss:$24 sps:$4 sm:$0xff]   ;;  %v2748_v5 = vld [vmem:[#allocation5 + $0x2a8] ss:$24 sps:$4 sm:$0xff]  }
  0x76   :  { %1918 = vmatprep.subr.bf16.mxu0 %v2661_v4  ;;  %v2745_v4 = vld [vmem:[#allocation5 + $0x8a0] ss:$24 sps:$4 sm:$0xff]  }
  0x77   :  { %1869 = vmatmul.mubr.bf16.vlgmr.msra.gmra.mrb[0].mxu1 %v3173_v6 }
  0x78   :  { %1910 = vmatmul.mubr.bf16.vlgmr.msra.gmra.mrb[0].mxu0 %v3175_v7  ;;  %1960 = vmatpush1.bf16.msra.mxu1 %v2662_v9  ;;  %v2756_v9 = vld [vmem:[#allocation5 + $0x2dc] ss:$24 sps:$4 sm:$0xff]  }
  0x79   :  { %1919 = vmatpush1.bf16.msra.mxu0 %v2659_v8  ;;  %1961 = vmatprep.subr.bf16.mxu1 %v2672_v11  ;;  %v2753_v8 = vld [vmem:[#allocation5 + $0x8d4] ss:$24 sps:$4 sm:$0xff]   ;;  %v2754_v11 = vld [vmem:[#allocation5 + $0x2d8] ss:$24 sps:$4 sm:$0xff]  }
  0x7a   :  { %1920 = vmatprep.subr.bf16.mxu0 %v2669_v10  ;;  %1991 = vmatprep.mubr.bf16.mxu1 %v3167_v47  ;;  %v2751_v10 = vld [vmem:[#allocation5 + $0x8d0] ss:$24 sps:$4 sm:$0xff]  }
  0x7b   :  { %1950 = vmatprep.mubr.bf16.mxu0 %v3184_v34 }
  0x7c   :  { %1962 = vmatpush1.bf16.msra.mxu1 %v2670_v13  ;;  %v2764_v13 = vld [vmem:[#allocation5 + $0x14] ss:$24 sps:$4 sm:$0xff]  }
  0x7d   :  { %1921 = vmatpush1.bf16.msra.mxu0 %v2667_v12  ;;  %1963 = vmatprep.subr.bf16.mxu1 %v2678_v15  ;;  %v2761_v12 = vld [vmem:[#allocation5 + $0x30c] ss:$24 sps:$4 sm:$0xff]   ;;  %v2759_v15 = vld [vmem:[#allocation5 + $0x308] ss:$24 sps:$4 sm:$0xff]  }
  0x7e   :  { %1922 = vmatprep.subr.bf16.mxu0 %v2675_v14  ;;  %v3189_v14 = vcombine.low %v3180_v32, %v3180_v32  ;;  %v2791_v32 = vld [vmem:[#allocation5 + $0x3fc] ss:$24 sps:$4 sm:$0xff]  }
  0x80   :  { %1964 = vmatpush1.bf16.msra.mxu1 %v2676_v17  ;;  %v2767_v17 = vld [vmem:[#allocation5 + $0x33c] ss:$24 sps:$4 sm:$0xff]  }
  0x81   :  { %1923 = vmatpush1.bf16.msra.mxu0 %v2673_v16  ;;  %1965 = vmatprep.subr.bf16.mxu1 %v2684_v19  ;;  %v2762_v16 = vld [vmem:[#allocation5 + $0x10] ss:$24 sps:$4 sm:$0xff]  }
  0x82   :  { %1924 = vmatprep.subr.bf16.mxu0 %v2681_v18  ;;  %v2770_v18 = vld [vmem:[#allocation5 + $0x44] ss:$24 sps:$4 sm:$0xff]   ;;  %v2765_v19 = vld [vmem:[#allocation5 + $0x338] ss:$24 sps:$4 sm:$0xff]  }
  0x84   :  { %1966 = vmatpush1.bf16.msra.mxu1 %v2682_v21  ;;  %v2773_v21 = vld [vmem:[#allocation5 + $0x36c] ss:$24 sps:$4 sm:$0xff]  }
  0x85   :  { %1925 = vmatpush1.bf16.msra.mxu0 %v2679_v20  ;;  %1967 = vmatprep.subr.bf16.mxu1 %v2690_v23  ;;  %v2768_v20 = vld [vmem:[#allocation5 + $0x40] ss:$24 sps:$4 sm:$0xff]  }
  0x86   :  { %1926 = vmatprep.subr.bf16.mxu0 %v2687_v22  ;;  %v2776_v22 = vld [vmem:[#allocation5 + $0x74] ss:$24 sps:$4 sm:$0xff]   ;;  %v2771_v23 = vld [vmem:[#allocation5 + $0x368] ss:$24 sps:$4 sm:$0xff]  }
  0x88   :  { %1968 = vmatpush1.bf16.msra.mxu1 %v2688_v25  ;;  %v2779_v25 = vld [vmem:[#allocation5 + $0x39c] ss:$24 sps:$4 sm:$0xff]  }
  0x89   :  { %1927 = vmatpush1.bf16.msra.mxu0 %v2685_v24  ;;  %1969 = vmatprep.subr.bf16.mxu1 %v2696_v27  ;;  %v2774_v24 = vld [vmem:[#allocation5 + $0x70] ss:$24 sps:$4 sm:$0xff]  }
  0x8a   :  { %1928 = vmatprep.subr.bf16.mxu0 %v2693_v26  ;;  %v2782_v26 = vld [vmem:[#allocation5 + $0xa4] ss:$24 sps:$4 sm:$0xff]   ;;  %v2777_v27 = vld [vmem:[#allocation5 + $0x398] ss:$24 sps:$4 sm:$0xff]  }
  0x8c   :  { %1970 = vmatpush1.bf16.msra.mxu1 %v2694_v29  ;;  %v2785_v29 = vld [vmem:[#allocation5 + $0x3cc] ss:$24 sps:$4 sm:$0xff]  }
  0x8d   :  { %1929 = vmatpush1.bf16.msra.mxu0 %v2691_v28  ;;  %1971 = vmatprep.subr.bf16.mxu1 %v2702_v31  ;;  %v2780_v28 = vld [vmem:[#allocation5 + $0xa0] ss:$24 sps:$4 sm:$0xff]  }
  0x8e   :  { %1930 = vmatprep.subr.bf16.mxu0 %v2699_v30  ;;  %v2788_v30 = vld [vmem:[#allocation5 + $0xd4] ss:$24 sps:$4 sm:$0xff]   ;;  %v2783_v31 = vld [vmem:[#allocation5 + $0x3c8] ss:$24 sps:$4 sm:$0xff]  }
  0x90   :  { %1972 = vmatpush1.bf16.msra.mxu1 %v2700_v35  ;;  %v2789_v35 = vld [vmem:[#allocation5 + $0x3f8] ss:$24 sps:$4 sm:$0xff]  }
  0x91   :  { %1931 = vmatpush1.bf16.msra.mxu0 %v2697_v33  ;;  %1973 = vmatprep.subr.bf16.mxu1 %v2708_v37  ;;  %v2794_v33 = vld [vmem:[#allocation5 + $0x104] ss:$24 sps:$4 sm:$0xff]  }
  0x92   :  { %1932 = vmatprep.subr.bf16.mxu0 %v2705_v36  ;;  %v2792_v36 = vld [vmem:[#allocation5 + $0x100] ss:$24 sps:$4 sm:$0xff]   ;;  %v2797_v37 = vld [vmem:[#allocation5 + $0x42c] ss:$24 sps:$4 sm:$0xff]  }
  0x94   :  { %1974 = vmatpush1.bf16.msra.mxu1 %v2706_v39  ;;  %v2795_v39 = vld [vmem:[#allocation5 + $0x428] ss:$24 sps:$4 sm:$0xff]  }
  0x95   :  { %1933 = vmatpush1.bf16.msra.mxu0 %v2703_v38  ;;  %1975 = vmatprep.subr.bf16.mxu1 %v2714_v41  ;;  %v2800_v38 = vld [vmem:[#allocation5 + $0x134] ss:$24 sps:$4 sm:$0xff]  }
  0x96   :  { %1934 = vmatprep.subr.bf16.mxu0 %v2711_v40  ;;  %v2798_v40 = vld [vmem:[#allocation5 + $0x130] ss:$24 sps:$4 sm:$0xff]   ;;  %v2803_v41 = vld [vmem:[#allocation5 + $0x45c] ss:$24 sps:$4 sm:$0xff]  }
  0x98   :  { %1976 = vmatpush1.bf16.msra.mxu1 %v2712_v43  ;;  %v2801_v43 = vld [vmem:[#allocation5 + $0x458] ss:$24 sps:$4 sm:$0xff]  }
  0x99   :  { %1935 = vmatpush1.bf16.msra.mxu0 %v2709_v42  ;;  %1977 = vmatprep.subr.bf16.mxu1 %v2720_v45  ;;  %v2806_v42 = vld [vmem:[#allocation5 + $0x164] ss:$24 sps:$4 sm:$0xff]  }
  0x9a   :  { %1936 = vmatprep.subr.bf16.mxu0 %v2717_v44  ;;  %v2804_v44 = vld [vmem:[#allocation5 + $0x160] ss:$24 sps:$4 sm:$0xff]   ;;  %v2809_v45 = vld [vmem:[#allocation5 + $0x48c] ss:$24 sps:$4 sm:$0xff]  }
  0x9c   :  { %1978 = vmatpush1.bf16.msra.mxu1 %v2718_v48  ;;  %v2807_v48 = vld [vmem:[#allocation5 + $0x488] ss:$24 sps:$4 sm:$0xff]  }
  0x9d   :  { %1937 = vmatpush1.bf16.msra.mxu0 %v2715_v46  ;;  %1979 = vmatprep.subr.bf16.mxu1 %v2726_v50  ;;  %v2812_v46 = vld [vmem:[#allocation5 + $0x194] ss:$24 sps:$4 sm:$0xff]  }
  0x9e   :  { %1938 = vmatprep.subr.bf16.mxu0 %v2723_v49  ;;  %v2810_v49 = vld [vmem:[#allocation5 + $0x190] ss:$24 sps:$4 sm:$0xff]   ;;  %v2815_v50 = vld [vmem:[#allocation5 + $0x4bc] ss:$24 sps:$4 sm:$0xff]  }
  0xa0   :  { %1980 = vmatpush1.bf16.msra.mxu1 %v2724_v53  ;;  %v2813_v53 = vld [vmem:[#allocation5 + $0x4b8] ss:$24 sps:$4 sm:$0xff]  }
  0xa1   :  { %1939 = vmatpush1.bf16.msra.mxu0 %v2721_v52  ;;  %1981 = vmatprep.subr.bf16.mxu1 %v2732_v55  ;;  %v2818_v52 = vld [vmem:[#allocation5 + $0x1c4] ss:$24 sps:$4 sm:$0xff]  }
  0xa2   :  { %1940 = vmatprep.subr.bf16.mxu0 %v2729_v54  ;;  %v2816_v54 = vld [vmem:[#allocation5 + $0x1c0] ss:$24 sps:$4 sm:$0xff]   ;;  %v2821_v55 = vld [vmem:[#allocation5 + $0x4ec] ss:$24 sps:$4 sm:$0xff]  }
  0xa4   :  { %1982 = vmatpush1.bf16.msra.mxu1 %v2730_v57  ;;  %v2819_v57 = vld [vmem:[#allocation5 + $0x4e8] ss:$24 sps:$4 sm:$0xff]  }
  0xa5   :  { %1941 = vmatpush1.bf16.msra.mxu0 %v2727_v56  ;;  %1983 = vmatprep.subr.bf16.mxu1 %v2738_v59  ;;  %v2824_v56 = vld [vmem:[#allocation5 + $0x1f4] ss:$24 sps:$4 sm:$0xff]  }
  0xa6   :  { %1942 = vmatprep.subr.bf16.mxu0 %v2735_v58  ;;  %v2822_v58 = vld [vmem:[#allocation5 + $0x1f0] ss:$24 sps:$4 sm:$0xff]   ;;  %v2827_v59 = vld [vmem:[#allocation5 + $0x51c] ss:$24 sps:$4 sm:$0xff]  }
  0xa8   :  { %1984 = vmatpush1.bf16.msra.mxu1 %v2736_v61  ;;  %v2825_v61 = vld [vmem:[#allocation5 + $0x518] ss:$24 sps:$4 sm:$0xff]  }
  0xa9   :  { %1943 = vmatpush1.bf16.msra.mxu0 %v2733_v60  ;;  %1985 = vmatprep.subr.bf16.mxu1 %v2744_v63  ;;  %v2830_v60 = vld [vmem:[#allocation5 + $0x224] ss:$24 sps:$4 sm:$0xff]  }
  0xaa   :  { %1944 = vmatprep.subr.bf16.mxu0 %v2741_v62  ;;  %v2828_v62 = vld [vmem:[#allocation5 + $0x220] ss:$24 sps:$4 sm:$0xff]   ;;  %v2833_v63 = vld [vmem:[#allocation5 + $0x54c] ss:$24 sps:$4 sm:$0xff]  }
  0xac   :  { %1986 = vmatpush1.bf16.msra.mxu1 %v2742_v1  ;;  %v2831_v1 = vld [vmem:[#allocation5 + $0x548] ss:$24 sps:$4 sm:$0xff]  }
  0xad   :  { %1945 = vmatpush1.bf16.msra.mxu0 %v2739_v0  ;;  %1987 = vmatprep.subr.bf16.mxu1 %v2750_v3  ;;  %v2836_v0 = vld [vmem:[#allocation5 + $0x254] ss:$24 sps:$4 sm:$0xff]  }
  0xae   :  { %1946 = vmatprep.subr.bf16.mxu0 %v2747_v2  ;;  %v2834_v2 = vld [vmem:[#allocation5 + $0x250] ss:$24 sps:$4 sm:$0xff]   ;;  %v2839_v3 = vld [vmem:[#allocation5 + $0x57c] ss:$24 sps:$4 sm:$0xff]  }
  0xb0   :  { %1988 = vmatpush1.bf16.msra.mxu1 %v2748_v5  ;;  %v2837_v5 = vld [vmem:[#allocation5 + $0x578] ss:$24 sps:$4 sm:$0xff]  }
  0xb1   :  { %1947 = vmatpush1.bf16.msra.mxu0 %v2745_v4  ;;  %1989 = vmatprep.subr.bf16.mxu1 %v2756_v9  ;;  %v2842_v4 = vld [vmem:[#allocation5 + $0x284] ss:$24 sps:$4 sm:$0xff]  }
  0xb2   :  { %1948 = vmatprep.subr.bf16.mxu0 %v2753_v8  ;;  %v2840_v8 = vld [vmem:[#allocation5 + $0x280] ss:$24 sps:$4 sm:$0xff]   ;;  %v2845_v9 = vld [vmem:[#allocation5 + $0x5ac] ss:$24 sps:$4 sm:$0xff]  }
  0xb4   :  { %1990 = vmatpush1.bf16.msra.mxu1 %v2754_v11  ;;  %v2843_v11 = vld [vmem:[#allocation5 + $0x5a8] ss:$24 sps:$4 sm:$0xff]  }
  0xb5   :  { %1949 = vmatpush1.bf16.msra.mxu0 %v2751_v10  ;;  %2000 = vmatprep.subr.bf16.mxu1 %v2761_v12  ;;  %v2848_v10 = vld [vmem:[#allocation5 + $0x2b4] ss:$24 sps:$4 sm:$0xff]   ;;  %v2846_v12 = vld [vmem:[#allocation5 + $0x2b0] ss:$24 sps:$4 sm:$0xff]  }
  0xb6   :  { %2082 = vmatprep.subr.bf16.mxu0 %v2764_v13  ;;  %v2851_v13 = vld [vmem:[#allocation5 + $0x5dc] ss:$24 sps:$4 sm:$0xff]  }
  0xb7   :  { %1992 = vmatmul.mubr.bf16.vlgmr.msra.gmra.mrb[4].mxu1 %v3173_v6 }
  0xb8   :  { %1951 = vmatmul.mubr.bf16.vlgmr.msra.gmra.mrb[0].mxu0 %v3189_v14  ;;  %2001 = vmatpush1.bf16.msra.mxu1 %v2759_v15  ;;  %v2854_v15 = vld [vmem:[#allocation5 + $0x2e4] ss:$24 sps:$4 sm:$0xff]  }
  0xb9   :  { %2083 = vmatpush1.bf16.msra.mxu0 %v2762_v16  ;;  %2002 = vmatprep.subr.bf16.mxu1 %v2767_v17  ;;  %v2849_v16 = vld [vmem:[#allocation5 + $0x5d8] ss:$24 sps:$4 sm:$0xff]  }
  0xba   :  { %2084 = vmatprep.subr.bf16.mxu0 %v2770_v18  ;;  %2032 = vmatprep.mubr.bf16.mxu1 %v3169_v51  ;;  %v2852_v17 = vld [vmem:[#allocation5 + $0x2e0] ss:$24 sps:$4 sm:$0xff]   ;;  %v2857_v18 = vld [vmem:[#allocation5 + $0x60c] ss:$24 sps:$4 sm:$0xff]  }
  0xbb   :  { %2114 = vmatprep.mubr.bf16.mxu0 %v3167_v47  ;;  %v2786_v47 = vld [vmem:[#allocation5 + $0xd0] ss:$24 sps:$4 sm:$0xff]  }
  0xbc   :  { %2003 = vmatpush1.bf16.msra.mxu1 %v2765_v19  ;;  %v2860_v19 = vld [vmem:[#allocation5 + $0x314] ss:$24 sps:$4 sm:$0xff]  }
  0xbd   :  { %2085 = vmatpush1.bf16.msra.mxu0 %v2768_v20  ;;  %2004 = vmatprep.subr.bf16.mxu1 %v2773_v21  ;;  %v2855_v20 = vld [vmem:[#allocation5 + $0x608] ss:$24 sps:$4 sm:$0xff]  }
  0xbe   :  { %2086 = vmatprep.subr.bf16.mxu0 %v2776_v22  ;;  %v2858_v21 = vld [vmem:[#allocation5 + $0x310] ss:$24 sps:$4 sm:$0xff]   ;;  %v2863_v22 = vld [vmem:[#allocation5 + $0x63c] ss:$24 sps:$4 sm:$0xff]  }
  0xc0   :  { %2005 = vmatpush1.bf16.msra.mxu1 %v2771_v23  ;;  %v2866_v23 = vld [vmem:[#allocation5 + $0x344] ss:$24 sps:$4 sm:$0xff]  }
  0xc1   :  { %2087 = vmatpush1.bf16.msra.mxu0 %v2774_v24  ;;  %2006 = vmatprep.subr.bf16.mxu1 %v2779_v25  ;;  %v2861_v24 = vld [vmem:[#allocation5 + $0x638] ss:$24 sps:$4 sm:$0xff]  }
  0xc2   :  { %2088 = vmatprep.subr.bf16.mxu0 %v2782_v26  ;;  %v2864_v25 = vld [vmem:[#allocation5 + $0x340] ss:$24 sps:$4 sm:$0xff]   ;;  %v2869_v26 = vld [vmem:[#allocation5 + $0x66c] ss:$24 sps:$4 sm:$0xff]  }
  0xc4   :  { %2007 = vmatpush1.bf16.msra.mxu1 %v2777_v27  ;;  %v2872_v27 = vld [vmem:[#allocation5 + $0x374] ss:$24 sps:$4 sm:$0xff]  }
  0xc5   :  { %2089 = vmatpush1.bf16.msra.mxu0 %v2780_v28  ;;  %2008 = vmatprep.subr.bf16.mxu1 %v2785_v29  ;;  %v2867_v28 = vld [vmem:[#allocation5 + $0x668] ss:$24 sps:$4 sm:$0xff]  }
  0xc6   :  { %2090 = vmatprep.subr.bf16.mxu0 %v2788_v30  ;;  %v2870_v29 = vld [vmem:[#allocation5 + $0x370] ss:$24 sps:$4 sm:$0xff]   ;;  %v2875_v30 = vld [vmem:[#allocation5 + $0x69c] ss:$24 sps:$4 sm:$0xff]  }
  0xc8   :  { %2009 = vmatpush1.bf16.msra.mxu1 %v2783_v31  ;;  %v2873_v31 = vld [vmem:[#allocation5 + $0x698] ss:$24 sps:$4 sm:$0xff]  }
  0xc9   :  { %2091 = vmatpush1.bf16.msra.mxu0 %v2786_v47  ;;  %2010 = vmatprep.subr.bf16.mxu1 %v2791_v32  ;;  %v2876_v47 = vld [vmem:[#allocation5 + $0x3a0] ss:$24 sps:$4 sm:$0xff]   ;;  %v2881_v32 = vld [vmem:[#allocation5 + $0x6cc] ss:$24 sps:$4 sm:$0xff]  }
  0xca   :  { %2092 = vmatprep.subr.bf16.mxu0 %v2794_v33  ;;  %v2884_v33 = vld [vmem:[#allocation5 + $0x3d4] ss:$24 sps:$4 sm:$0xff]  }
  0xcc   :  { %2011 = vmatpush1.bf16.msra.mxu1 %v2789_v35  ;;  %v2879_v35 = vld [vmem:[#allocation5 + $0x6c8] ss:$24 sps:$4 sm:$0xff]  }
  0xcd   :  { %2093 = vmatpush1.bf16.msra.mxu0 %v2792_v36  ;;  %2012 = vmatprep.subr.bf16.mxu1 %v2797_v37  ;;  %v2887_v36 = vld [vmem:[#allocation5 + $0x6fc] ss:$24 sps:$4 sm:$0xff]  }
  0xce   :  { %2094 = vmatprep.subr.bf16.mxu0 %v2800_v38  ;;  %v2890_v37 = vld [vmem:[#allocation5 + $0x404] ss:$24 sps:$4 sm:$0xff]   ;;  %v2885_v38 = vld [vmem:[#allocation5 + $0x6f8] ss:$24 sps:$4 sm:$0xff]  }
  0xd0   :  { %2013 = vmatpush1.bf16.msra.mxu1 %v2795_v39  ;;  %v2888_v39 = vld [vmem:[#allocation5 + $0x400] ss:$24 sps:$4 sm:$0xff]  }
  0xd1   :  { %2095 = vmatpush1.bf16.msra.mxu0 %v2798_v40  ;;  %2014 = vmatprep.subr.bf16.mxu1 %v2803_v41  ;;  %v2893_v40 = vld [vmem:[#allocation5 + $0x72c] ss:$24 sps:$4 sm:$0xff]  }
  0xd2   :  { %2096 = vmatprep.subr.bf16.mxu0 %v2806_v42  ;;  %v2896_v41 = vld [vmem:[#allocation5 + $0x434] ss:$24 sps:$4 sm:$0xff]   ;;  %v2891_v42 = vld [vmem:[#allocation5 + $0x728] ss:$24 sps:$4 sm:$0xff]  }
  0xd4   :  { %2015 = vmatpush1.bf16.msra.mxu1 %v2801_v43  ;;  %v2894_v43 = vld [vmem:[#allocation5 + $0x430] ss:$24 sps:$4 sm:$0xff]  }
  0xd5   :  { %2097 = vmatpush1.bf16.msra.mxu0 %v2804_v44  ;;  %2016 = vmatprep.subr.bf16.mxu1 %v2809_v45  ;;  %v2899_v44 = vld [vmem:[#allocation5 + $0x75c] ss:$24 sps:$4 sm:$0xff]  }
  0xd6   :  { %2098 = vmatprep.subr.bf16.mxu0 %v2812_v46  ;;  %v2902_v45 = vld [vmem:[#allocation5 + $0x464] ss:$24 sps:$4 sm:$0xff]   ;;  %v2897_v46 = vld [vmem:[#allocation5 + $0x758] ss:$24 sps:$4 sm:$0xff]  }
  0xd8   :  { %2017 = vmatpush1.bf16.msra.mxu1 %v2807_v48  ;;  %v2900_v48 = vld [vmem:[#allocation5 + $0x460] ss:$24 sps:$4 sm:$0xff]  }
  0xd9   :  { %2099 = vmatpush1.bf16.msra.mxu0 %v2810_v49  ;;  %2018 = vmatprep.subr.bf16.mxu1 %v2815_v50  ;;  %v2905_v49 = vld [vmem:[#allocation5 + $0x78c] ss:$24 sps:$4 sm:$0xff]  }
  0xda   :  { %2100 = vmatprep.subr.bf16.mxu0 %v2818_v52  ;;  %v2908_v50 = vld [vmem:[#allocation5 + $0x494] ss:$24 sps:$4 sm:$0xff]   ;;  %v2903_v52 = vld [vmem:[#allocation5 + $0x788] ss:$24 sps:$4 sm:$0xff]  }
  0xdc   :  { %2019 = vmatpush1.bf16.msra.mxu1 %v2813_v53  ;;  %v2906_v53 = vld [vmem:[#allocation5 + $0x490] ss:$24 sps:$4 sm:$0xff]  }
  0xdd   :  { %2101 = vmatpush1.bf16.msra.mxu0 %v2816_v54  ;;  %2020 = vmatprep.subr.bf16.mxu1 %v2821_v55  ;;  %v2911_v54 = vld [vmem:[#allocation5 + $0x7bc] ss:$24 sps:$4 sm:$0xff]  }
  0xde   :  { %2102 = vmatprep.subr.bf16.mxu0 %v2824_v56  ;;  %v2914_v55 = vld [vmem:[#allocation5 + $0x4c4] ss:$24 sps:$4 sm:$0xff]   ;;  %v2909_v56 = vld [vmem:[#allocation5 + $0x7b8] ss:$24 sps:$4 sm:$0xff]  }
  0xe0   :  { %2021 = vmatpush1.bf16.msra.mxu1 %v2819_v57  ;;  %v2912_v57 = vld [vmem:[#allocation5 + $0x4c0] ss:$24 sps:$4 sm:$0xff]  }
  0xe1   :  { %2103 = vmatpush1.bf16.msra.mxu0 %v2822_v58  ;;  %2022 = vmatprep.subr.bf16.mxu1 %v2827_v59  ;;  %v2917_v58 = vld [vmem:[#allocation5 + $0x7ec] ss:$24 sps:$4 sm:$0xff]  }
  0xe2   :  { %2104 = vmatprep.subr.bf16.mxu0 %v2830_v60  ;;  %v2920_v59 = vld [vmem:[#allocation5 + $0x4f4] ss:$24 sps:$4 sm:$0xff]   ;;  %v2915_v60 = vld [vmem:[#allocation5 + $0x7e8] ss:$24 sps:$4 sm:$0xff]  }
  0xe4   :  { %2023 = vmatpush1.bf16.msra.mxu1 %v2825_v61  ;;  %v2918_v61 = vld [vmem:[#allocation5 + $0x4f0] ss:$24 sps:$4 sm:$0xff]  }
  0xe5   :  { %2105 = vmatpush1.bf16.msra.mxu0 %v2828_v62  ;;  %2024 = vmatprep.subr.bf16.mxu1 %v2833_v63  ;;  %v2923_v62 = vld [vmem:[#allocation5 + $0x81c] ss:$24 sps:$4 sm:$0xff]  }
  0xe6   :  { %2106 = vmatprep.subr.bf16.mxu0 %v2836_v0  ;;  %v2926_v63 = vld [vmem:[#allocation5 + $0x524] ss:$24 sps:$4 sm:$0xff]   ;;  %v2921_v0 = vld [vmem:[#allocation5 + $0x818] ss:$24 sps:$4 sm:$0xff]  }
  0xe8   :  { %2025 = vmatpush1.bf16.msra.mxu1 %v2831_v1  ;;  %v2924_v1 = vld [vmem:[#allocation5 + $0x520] ss:$24 sps:$4 sm:$0xff]  }
  0xe9   :  { %2107 = vmatpush1.bf16.msra.mxu0 %v2834_v2  ;;  %2026 = vmatprep.subr.bf16.mxu1 %v2839_v3  ;;  %v2929_v2 = vld [vmem:[#allocation5 + $0x84c] ss:$24 sps:$4 sm:$0xff]  }
  0xea   :  { %2108 = vmatprep.subr.bf16.mxu0 %v2842_v4  ;;  %v2932_v3 = vld [vmem:[#allocation5 + $0x554] ss:$24 sps:$4 sm:$0xff]   ;;  %v2927_v4 = vld [vmem:[#allocation5 + $0x848] ss:$24 sps:$4 sm:$0xff]  }
  0xec   :  { %2027 = vmatpush1.bf16.msra.mxu1 %v2837_v5  ;;  %v2930_v5 = vld [vmem:[#allocation5 + $0x550] ss:$24 sps:$4 sm:$0xff]  }
  0xed   :  { %2109 = vmatpush1.bf16.msra.mxu0 %v2840_v8  ;;  %2028 = vmatprep.subr.bf16.mxu1 %v2845_v9  ;;  %v2935_v8 = vld [vmem:[#allocation5 + $0x87c] ss:$24 sps:$4 sm:$0xff]  }
  0xee   :  { %2110 = vmatprep.subr.bf16.mxu0 %v2848_v10  ;;  %v2938_v9 = vld [vmem:[#allocation5 + $0x584] ss:$24 sps:$4 sm:$0xff]   ;;  %v2933_v10 = vld [vmem:[#allocation5 + $0x878] ss:$24 sps:$4 sm:$0xff]  }
  0xf0   :  { %2029 = vmatpush1.bf16.msra.mxu1 %v2843_v11  ;;  %v2936_v11 = vld [vmem:[#allocation5 + $0x580] ss:$24 sps:$4 sm:$0xff]  }
  0xf1   :  { %2111 = vmatpush1.bf16.msra.mxu0 %v2846_v12  ;;  %2030 = vmatprep.subr.bf16.mxu1 %v2851_v13  ;;  %v2941_v12 = vld [vmem:[#allocation5 + $0x8ac] ss:$24 sps:$4 sm:$0xff]  }
  0xf2   :  { %2112 = vmatprep.subr.bf16.mxu0 %v2854_v15  ;;  %v2944_v13 = vld [vmem:[#allocation5 + $0x5b4] ss:$24 sps:$4 sm:$0xff]   ;;  %v2939_v15 = vld [vmem:[#allocation5 + $0x8a8] ss:$24 sps:$4 sm:$0xff]  }
  0xf4   :  { %2031 = vmatpush1.bf16.msra.mxu1 %v2849_v16  ;;  %v2942_v16 = vld [vmem:[#allocation5 + $0x5b0] ss:$24 sps:$4 sm:$0xff]  }
  0xf5   :  { %2113 = vmatpush1.bf16.msra.mxu0 %v2852_v17  ;;  %2041 = vmatprep.subr.bf16.mxu1 %v2857_v18  ;;  %v2947_v17 = vld [vmem:[#allocation5 + $0x8dc] ss:$24 sps:$4 sm:$0xff]  }
  0xf6   :  { %2123 = vmatprep.subr.bf16.mxu0 %v2860_v19  ;;  %v2950_v18 = vld [vmem:[#allocation5 + $0x5e4] ss:$24 sps:$4 sm:$0xff]   ;;  %v2945_v19 = vld [vmem:[#allocation5 + $0x8d8] ss:$24 sps:$4 sm:$0xff]  }
  0xf7   :  { %2033 = vmatmul.mubr.bf16.vlgmr.msra.gmra.mrb[4].mxu1 %v3175_v7 }
  0xf8   :  { %2115 = vmatmul.mubr.bf16.vlgmr.msra.gmra.mrb[4].mxu0 %v3173_v6  ;;  %2042 = vmatpush1.bf16.msra.mxu1 %v2855_v20  ;;  %v2878_v6 = vld [vmem:[#allocation5 + $0x3a4] ss:$24 sps:$4 sm:$0xff]   ;;  %v2948_v20 = vld [vmem:[#allocation5 + $0x5e0] ss:$24 sps:$4 sm:$0xff]  }
  0xf9   :  { %2124 = vmatpush1.bf16.msra.mxu0 %v2858_v21  ;;  %2043 = vmatprep.subr.bf16.mxu1 %v2863_v22  ;;  %v2953_v21 = vld [vmem:[#allocation5 + $0x614] ss:$24 sps:$4 sm:$0xff]   ;;  %v2951_v22 = vld [vmem:[#allocation5 + $0x610] ss:$24 sps:$4 sm:$0xff]  }
  0xfa   :  { %2125 = vmatprep.subr.bf16.mxu0 %v2866_v23  ;;  %2073 = vmatprep.mubr.bf16.mxu1 %v3184_v34  ;;  %v2956_v23 = vld [vmem:[#allocation5 + $0x644] ss:$24 sps:$4 sm:$0xff]  }
  0xfb   :  { %2155 = vmatprep.mubr.bf16.mxu0 %v3169_v51  ;;  %v2882_v51 = vld [vmem:[#allocation5 + $0x3d0] ss:$24 sps:$4 sm:$0xff]  }
  0xfc   :  { %2044 = vmatpush1.bf16.msra.mxu1 %v2861_v24  ;;  %v2954_v24 = vld [vmem:[#allocation5 + $0x640] ss:$24 sps:$4 sm:$0xff]  }
  0xfd   :  { %2126 = vmatpush1.bf16.msra.mxu0 %v2864_v25  ;;  %2045 = vmatprep.subr.bf16.mxu1 %v2869_v26  ;;  %v2959_v25 = vld [vmem:[#allocation5 + $0x674] ss:$24 sps:$4 sm:$0xff]   ;;  %v2957_v26 = vld [vmem:[#allocation5 + $0x670] ss:$24 sps:$4 sm:$0xff]  }
  0xfe   :  { %2127 = vmatprep.subr.bf16.mxu0 %v2872_v27  ;;  %v2962_v27 = vld [vmem:[#allocation5 + $0x6a4] ss:$24 sps:$4 sm:$0xff]  }
 0x100   :  { %2046 = vmatpush1.bf16.msra.mxu1 %v2867_v28  ;;  %v2960_v28 = vld [vmem:[#allocation5 + $0x6a0] ss:$24 sps:$4 sm:$0xff]  }
 0x101   :  { %2128 = vmatpush1.bf16.msra.mxu0 %v2870_v29  ;;  %2047 = vmatprep.subr.bf16.mxu1 %v2875_v30  ;;  %v2965_v29 = vld [vmem:[#allocation5 + $0x6d4] ss:$24 sps:$4 sm:$0xff]   ;;  %v2963_v30 = vld [vmem:[#allocation5 + $0x6d0] ss:$24 sps:$4 sm:$0xff]  }
 0x102   :  { %2129 = vmatprep.subr.bf16.mxu0 %v2878_v6  ;;  %v2968_v6 = vld [vmem:[#allocation5 + $0x704] ss:$24 sps:$4 sm:$0xff]  }
 0x104   :  { %2048 = vmatpush1.bf16.msra.mxu1 %v2873_v31  ;;  %v2971_v31 = vld [vmem:[#allocation5 + $0x734] ss:$24 sps:$4 sm:$0xff]  }
 0x105   :  { %2130 = vmatpush1.bf16.msra.mxu0 %v2876_v47  ;;  %2049 = vmatprep.subr.bf16.mxu1 %v2881_v32  ;;  %v2969_v32 = vld [vmem:[#allocation5 + $0x730] ss:$24 sps:$4 sm:$0xff]  }
 0x106   :  { %2131 = vmatprep.subr.bf16.mxu0 %v2884_v33 }
 0x108   :  { %2050 = vmatpush1.bf16.msra.mxu1 %v2879_v35  ;;  %v2974_v35 = vld [vmem:[#allocation5 + $0x764] ss:$24 sps:$4 sm:$0xff]  }
 0x109   :  { %2132 = vmatpush1.bf16.msra.mxu0 %v2882_v51  ;;  %2051 = vmatprep.subr.bf16.mxu1 %v2887_v36  ;;  %v2972_v36 = vld [vmem:[#allocation5 + $0x760] ss:$24 sps:$4 sm:$0xff]  }
 0x10a   :  { %2133 = vmatprep.subr.bf16.mxu0 %v2890_v37  ;;  %v2977_v37 = vld [vmem:[#allocation5 + $0x794] ss:$24 sps:$4 sm:$0xff]  }
 0x10c   :  { %2052 = vmatpush1.bf16.msra.mxu1 %v2885_v38  ;;  %v2975_v38 = vld [vmem:[#allocation5 + $0x790] ss:$24 sps:$4 sm:$0xff]  }
 0x10d   :  { %2134 = vmatpush1.bf16.msra.mxu0 %v2888_v39  ;;  %2053 = vmatprep.subr.bf16.mxu1 %v2893_v40  ;;  %v2980_v39 = vld [vmem:[#allocation5 + $0x7c4] ss:$24 sps:$4 sm:$0xff]   ;;  %v2978_v40 = vld [vmem:[#allocation5 + $0x7c0] ss:$24 sps:$4 sm:$0xff]  }
 0x10e   :  { %2135 = vmatprep.subr.bf16.mxu0 %v2896_v41  ;;  %v2983_v41 = vld [vmem:[#allocation5 + $0x7f4] ss:$24 sps:$4 sm:$0xff]  }
 0x110   :  { %2054 = vmatpush1.bf16.msra.mxu1 %v2891_v42  ;;  %v2981_v42 = vld [vmem:[#allocation5 + $0x7f0] ss:$24 sps:$4 sm:$0xff]  }
 0x111   :  { %2136 = vmatpush1.bf16.msra.mxu0 %v2894_v43  ;;  %2055 = vmatprep.subr.bf16.mxu1 %v2899_v44  ;;  %v2986_v43 = vld [vmem:[#allocation5 + $0x824] ss:$24 sps:$4 sm:$0xff]   ;;  %v2984_v44 = vld [vmem:[#allocation5 + $0x820] ss:$24 sps:$4 sm:$0xff]  }
 0x112   :  { %2137 = vmatprep.subr.bf16.mxu0 %v2902_v45  ;;  %v2989_v45 = vld [vmem:[#allocation5 + $0x854] ss:$24 sps:$4 sm:$0xff]  }
 0x114   :  { %2056 = vmatpush1.bf16.msra.mxu1 %v2897_v46  ;;  %v2987_v46 = vld [vmem:[#allocation5 + $0x850] ss:$24 sps:$4 sm:$0xff]  }
 0x115   :  { %2138 = vmatpush1.bf16.msra.mxu0 %v2900_v48  ;;  %2057 = vmatprep.subr.bf16.mxu1 %v2905_v49  ;;  %v2992_v48 = vld [vmem:[#allocation5 + $0x884] ss:$24 sps:$4 sm:$0xff]   ;;  %v2990_v49 = vld [vmem:[#allocation5 + $0x880] ss:$24 sps:$4 sm:$0xff]  }
 0x116   :  { %2139 = vmatprep.subr.bf16.mxu0 %v2908_v50  ;;  %v2995_v50 = vld [vmem:[#allocation5 + $0x8b4] ss:$24 sps:$4 sm:$0xff]  }
 0x118   :  { %2058 = vmatpush1.bf16.msra.mxu1 %v2903_v52  ;;  %v2993_v52 = vld [vmem:[#allocation5 + $0x8b0] ss:$24 sps:$4 sm:$0xff]  }
 0x119   :  { %2140 = vmatpush1.bf16.msra.mxu0 %v2906_v53  ;;  %2059 = vmatprep.subr.bf16.mxu1 %v2911_v54  ;;  %v2998_v53 = vld [vmem:[#allocation5 + $0x8e4] ss:$24 sps:$4 sm:$0xff]   ;;  %v2996_v54 = vld [vmem:[#allocation5 + $0x8e0] ss:$24 sps:$4 sm:$0xff]  }
 0x11a   :  { %2141 = vmatprep.subr.bf16.mxu0 %v2914_v55  ;;  %v345_v55 = vlaneseq }
 0x11c   :  { %2060 = vmatpush1.bf16.msra.mxu1 %v2909_v56  ;;  %v346_v56 = vshrl.u32 %v345_v55, 7 }
 0x11d   :  { %2142 = vmatpush1.bf16.msra.mxu0 %v2912_v57  ;;  %2061 = vmatprep.subr.bf16.mxu1 %v2917_v58  ;;  %v343_v58 = vld [vmem:[#allocation7] sm:$0x3f] }
 0x11e   :  { %2143 = vmatprep.subr.bf16.mxu0 %v2920_v59  ;;  %v347_v57 = vsub.s32 0, %v346_v56  ;;  %v351_v59 = vsub.s32 1, %v346_v56 }
 0x120   :  { %2062 = vmatpush1.bf16.msra.mxu1 %v2915_v60  ;;  %v348_v60 = vrot.slane %v343_v58, %v347_v57 }
 0x121   :  { %2144 = vmatpush1.bf16.msra.mxu0 %v2918_v61  ;;  %2063 = vmatprep.subr.bf16.mxu1 %v2923_v62  ;;  %v352_v61 = vrot.slane %v343_v58, %v351_v59 }
 0x122   :  { %2145 = vmatprep.subr.bf16.mxu0 %v2926_v63 }
 0x124   :  { %2064 = vmatpush1.bf16.msra.mxu1 %v2921_v0 }
 0x125   :  { %2146 = vmatpush1.bf16.msra.mxu0 %v2924_v1  ;;  %2065 = vmatprep.subr.bf16.mxu1 %v2929_v2 }
 0x126   :  { %2147 = vmatprep.subr.bf16.mxu0 %v2932_v3 }
 0x128   :  { %2066 = vmatpush1.bf16.msra.mxu1 %v2927_v4 }
 0x129   :  { %2148 = vmatpush1.bf16.msra.mxu0 %v2930_v5  ;;  %2067 = vmatprep.subr.bf16.mxu1 %v2935_v8 }
 0x12a   :  { %2149 = vmatprep.subr.bf16.mxu0 %v2938_v9 }
 0x12c   :  { %2068 = vmatpush1.bf16.msra.mxu1 %v2933_v10  ;;  %v359_v10 = vsub.s32 3, %v346_v56 }
 0x12d   :  { %2150 = vmatpush1.bf16.msra.mxu0 %v2936_v11  ;;  %2069 = vmatprep.subr.bf16.mxu1 %v2941_v12 }
 0x12e   :  { %2151 = vmatprep.subr.bf16.mxu0 %v2944_v13  ;;  %v360_v12 = vrot.slane %v343_v58, %v359_v10 }
 0x130   :  { %2070 = vmatpush1.bf16.msra.mxu1 %v2939_v15 }
 0x131   :  { %2152 = vmatpush1.bf16.msra.mxu0 %v2942_v16  ;;  %2071 = vmatprep.subr.bf16.mxu1 %v2947_v17 }
 0x132   :  { %2153 = vmatprep.subr.bf16.mxu0 %v2950_v18 }
 0x134   :  { %2072 = vmatpush1.bf16.msra.mxu1 %v2945_v19 }
 0x135   :  { %2154 = vmatpush1.bf16.msra.mxu0 %v2948_v20 }
 0x136   :  { %2164 = vmatprep.subr.bf16.mxu0 %v2953_v21 }
 0x137   :  { %2074 = vmatmul.mubr.bf16.vlgmr.msra.gmra.mrb[4].mxu1 %v3189_v14 }
 0x138   :  { %2156 = vmatmul.mubr.bf16.vlgmr.msra.gmra.mrb[4].mxu0 %v3175_v7  ;;  %v2966_v7 = vld [vmem:[#allocation5 + $0x700] ss:$24 sps:$4 sm:$0xff]  }
 0x139   :  { %2165 = vmatpush1.bf16.msra.mxu0 %v2951_v22  ;;  %2196 = vmatprep.mubr.bf16.mxu0 %v3184_v34  ;;  %v363_v22 = vsub.s32 4, %v346_v56 }
 0x13a   :  { %2166 = vmatprep.subr.bf16.mxu0 %v2956_v23  ;;  %v367_v23 = vsub.s32 5, %v346_v56 }
 0x13d   :  { %2167 = vmatpush1.bf16.msra.mxu0 %v2954_v24  ;;  %v364_v24 = vrot.slane %v343_v58, %v363_v22 }
 0x13e   :  { %2168 = vmatprep.subr.bf16.mxu0 %v2959_v25  ;;  %v368_v25 = vrot.slane %v343_v58, %v367_v23 }
 0x141   :  { %2169 = vmatpush1.bf16.msra.mxu0 %v2957_v26 }
 0x142   :  { %2170 = vmatprep.subr.bf16.mxu0 %v2962_v27 }
 0x145   :  { %2171 = vmatpush1.bf16.msra.mxu0 %v2960_v28 }
 0x146   :  { %2172 = vmatprep.subr.bf16.mxu0 %v2965_v29 }
 0x149   :  { %2173 = vmatpush1.bf16.msra.mxu0 %v2963_v30 }
 0x14a   :  { %2174 = vmatprep.subr.bf16.mxu0 %v2968_v6  ;;  %v1870_v47 = vpop.f32.mrb[0].mxu1 }
 0x14b   :  { %v1872_v34 = vpop.f32.mrb[1].mxu1  ;;  %v1871_v62 = vadd.f32 %v1870_v47, %v348_v60 }
 0x14c   :  { %v1874_v33 = vpop.f32.mrb[2].mxu1  ;;  %v1873_v63 = vadd.f32 %v1872_v34, %v352_v61 }
 0x14d   :  { %2175 = vmatpush1.bf16.msra.mxu0 %v2966_v7  ;;  %v1875_v51 = vpop.f32.mrb[3].mxu1 }
 0x14e   :  { %2176 = vmatprep.subr.bf16.mxu0 %v2971_v31 }
 0x151   :  { %2177 = vmatpush1.bf16.msra.mxu0 %v2969_v32 }
 0x152   :  { %2178 = vmatprep.subr.bf16.mxu0 %v2974_v35 }
 0x155   :  { %2179 = vmatpush1.bf16.msra.mxu0 %v2972_v36 }
 0x156   :  { %2180 = vmatprep.subr.bf16.mxu0 %v2977_v37 }
 0x159   :  { %2181 = vmatpush1.bf16.msra.mxu0 %v2975_v38 }
 0x15a   :  { %2182 = vmatprep.subr.bf16.mxu0 %v2980_v39 }
 0x15d   :  { %2183 = vmatpush1.bf16.msra.mxu0 %v2978_v40 }
 0x15e   :  { %2184 = vmatprep.subr.bf16.mxu0 %v2983_v41 }
 0x161   :  { %2185 = vmatpush1.bf16.msra.mxu0 %v2981_v42 }
 0x162   :  { %2186 = vmatprep.subr.bf16.mxu0 %v2986_v43 }
 0x165   :  { %2187 = vmatpush1.bf16.msra.mxu0 %v2984_v44 }
 0x166   :  { %2188 = vmatprep.subr.bf16.mxu0 %v2989_v45 }
 0x169   :  { %2189 = vmatpush1.bf16.msra.mxu0 %v2987_v46 }
 0x16a   :  { %2190 = vmatprep.subr.bf16.mxu0 %v2992_v48 }
 0x16d   :  { %2191 = vmatpush1.bf16.msra.mxu0 %v2990_v49 }
 0x16e   :  { %2192 = vmatprep.subr.bf16.mxu0 %v2995_v50 }
 0x171   :  { %2193 = vmatpush1.bf16.msra.mxu0 %v2993_v52 }
 0x172   :  { %2194 = vmatprep.subr.bf16.mxu0 %v2998_v53 }
 0x175   :  { %2195 = vmatpush1.bf16.msra.mxu0 %v2996_v54 }
 0x178   :  { %2197 = vmatmul.mubr.bf16.vlgmr.msra.gmra.mrb[4].mxu0 %v3189_v14  ;;  %v355_v14 = vsub.s32 2, %v346_v56 }
 0x17a   :  { %v356_v11 = vrot.slane %v343_v58, %v355_v14 }
 0x18b   :  { %v1952_v0 = vpop.f32.mrb[0].mxu0 }
 0x18c   :  { %v2528_v1 = vadd.f32 %v1952_v0, %v1871_v62  ;;  %v1954_v2 = vpop.f32.mrb[1].mxu0 }
 0x18d   :  { %v2530_v3 = vadd.f32 %v1954_v2, %v1873_v63  ;;  %v1956_v4 = vpop.f32.mrb[2].mxu0 }
 0x18e   :  { %2999 = vtanh.f32 %v2528_v1  ;;  %v1957_v5 = vpop.f32.mrb[3].mxu0 }
 0x18f   :  { %3001 = vtanh.f32 %v2530_v3 }
 0x198   :  { %v3000_v8 = vpop.eup %2999 }
 0x199   :  { %v3002_v9 = vpop.eup %3001  ;;  %2211 = vst [vmem:[#allocation8] sm:$0xff] %v3000_v8 }
 0x19a   :  { %2212 = vst [vmem:[#allocation8 + $0x8] sm:$0xff] %v3002_v9 }
 0x20a   :  { %v2075_v13 = vpop.f32.mrb[4].mxu1 }
 0x20b   :  { %v2531_v15 = vadd.f32 %v2075_v13, %v356_v11  ;;  %v2077_v16 = vpop.f32.mrb[5].mxu1 }
 0x20c   :  { %v2532_v17 = vadd.f32 %v2077_v16, %v360_v12  ;;  %v2079_v18 = vpop.f32.mrb[6].mxu1 }
 0x20d   :  { %3003 = vtanh.f32 %v2531_v15  ;;  %v2080_v19 = vpop.f32.mrb[7].mxu1 }
 0x20e   :  { %3005 = vtanh.f32 %v2532_v17 }
 0x217   :  { %v3004_v20 = vpop.eup %3003 }
 0x218   :  { %v3006_v21 = vpop.eup %3005  ;;  %2213 = vst [vmem:[#allocation8 + $0x10] sm:$0xff] %v3004_v20 }
 0x219   :  { %2214 = vst [vmem:[#allocation8 + $0x18] sm:$0xff] %v3006_v21 }
 0x24b   :  { %v2198_v26 = vpop.f32.mrb[4].mxu0 }
 0x24c   :  { %v2533_v27 = vadd.f32 %v2198_v26, %v364_v24  ;;  %v2200_v28 = vpop.f32.mrb[5].mxu0 }
 0x24d   :  { %v2534_v29 = vadd.f32 %v2200_v28, %v368_v25  ;;  %v2202_v30 = vpop.f32.mrb[6].mxu0 }
 0x24e   :  { %3007 = vtanh.f32 %v2533_v27  ;;  %v2203_v6 = vpop.f32.mrb[7].mxu0 }
 0x24f   :  { %3009 = vtanh.f32 %v2534_v29 }
 0x258   :  { %v3008_v7 = vpop.eup %3007 }
 0x259   :  { %v3010_v31 = vpop.eup %3009  ;;  %2215 = vst [vmem:[#allocation8 + $0x20] sm:$0xff] %v3008_v7 }
 0x25a   :  { %2216 = vst [vmem:[#allocation8 + $0x28] sm:$0xff] %v3010_v31 }
 0x25b   :  { %3088 = shalt.err (!%p3085_p0)
}
 0x25c   :  { %s3089_s25 = scalar_lea.hbm %s3218_s3, 768 }
 0x25d   :  { %p3090_p1 = scmp.ne.s32.totalorder %s3218_s3, %s3089_s25  ;;  %p3093_p2 = scmp.lt.u32.totalorder %s3089_s25, %s3218_s3 }
 0x25f   :  { %p3095_p3 = pnand %p3093_p2, %p3090_p1 }
 0x261   :  { %3098 = shalt.err (!%p3095_p3)
}
 0x262   :  { %2226 = dma.vmem_to_hbm [thread:$0]  %s2224_s21, 768, %s3218_s3, [#allocation4]  }
 0x263   :  { %3103 = dma.done.wait [#allocation4], 768  }
 0x264   :  { %3104 = vsyncadd [#allocation4], 4294966528 }
 0x265   :  { %2230 = vsyncpa [#allocation3], 1 }
 0x266   :  { %2231 = vsyncpa [#allocation6], 1 }
 0x267   :  { %2232 = vsyncpa [#allocation4], 1 }

</bundles_post_ra>
